<compile_context>
chip_gen: v6e
topology: v6e:2x2x1
jax: 0.10.0
libtpu: 0.0.40
codegen_flags: <defaults>
</compile_context>

<pallas_src>
import math

import jax
import jax.numpy as jnp
from jax.experimental import pallas as pl
from jax.experimental.pallas import tpu as pltpu


def _flatten_copy_kernel(x_ref, o_ref):
    # Identity copy of the current (block_rows, lane) tile.
    o_ref[...] = x_ref[...]


def _chip_profile():
    """Generation-aware tiling parameters keyed on device_kind."""
    kind = ""
    try:
        kind = jax.devices()[0].device_kind.lower()
    except Exception:  # pragma: no cover - defensive; fall back to defaults
        pass
    if "v5 lite" in kind or "v5e" in kind or "v5lite" in kind:
        # ~820 GB/s HBM, 16 MiB default scoped VMEM: 2 MiB tiles are already
        # ~5 us of DMA, so bigger tiles buy nothing; keep the limit modest.
        return dict(target_tile=2 << 20, full_tile_cap=6 << 20,
                    vmem_cap=12 << 20, prefer_even_steps=False)
    if "v6" in kind:
        # 128 MiB VMEM part, ~1.4 TB/s: allow larger tiles / scoped VMEM.
        return dict(target_tile=4 << 20, full_tile_cap=8 << 20,
                    vmem_cap=40 << 20, prefer_even_steps=False)
    if "7" in kind:
        # v7x: 64 MiB VMEM per TC, ~3.2 TB/s, 2 TensorCores -> bigger tiles
        # (step overhead amortization) and even >=2-step grids for sharding.
        return dict(target_tile=5 << 20, full_tile_cap=8 << 20,
                    vmem_cap=32 << 20, prefer_even_steps=True)
    # Unknown generation: conservative middle ground.
    return dict(target_tile=2 << 20, full_tile_cap=6 << 20,
                vmem_cap=16 << 20, prefer_even_steps=False)


def _pick_lane(total, sub):
    """Widest 128-multiple lane dividing `total`, preferring one that also
    leaves a sublane-aligned, >= 2*sub row count (tileable / shardable)."""
    candidates = [lw for lw in (1024, 512, 256, 128) if total % lw == 0]
    if not candidates:
        return None
    for lw in candidates:
        rows = total // lw
        if rows % sub == 0 and rows >= 2 * sub:
            return lw
    return candidates[0]


def _pick_block_rows(rows, row_bytes, sub, target_tile_bytes, prefer_even_steps):
    """Largest row block that is a multiple of `sub`, divides `rows`, and keeps
    the tile near `target_tile_bytes`.  On v7x, prefer a block that yields an
    even (>= 2) number of grid steps so both TensorCores stay busy."""
    if rows <= sub or rows % sub != 0:
        return rows  # full-extent block (allowed by the (8,128) rule)
    cap = (target_tile_bytes // row_bytes) // sub * sub
    cap = max(sub, min(cap, rows))
    first = None
    for br in range(cap, sub - 1, -sub):
        if rows % br != 0:
            continue
        if first is None:
            first = br
        steps = rows // br
        if not prefer_even_steps or (steps >= 2 and steps % 2 == 0):
            return br
    return first if first is not None else sub


def flatten_pallas(x, *, force_copy=False, donate=False):
    """Flatten x: (N, ...) -> (N, prod(rest)).

    Default path is the metadata-only reshape (zero HBM traffic).  When
    `force_copy=True`, a lane-dense identity-copy Pallas kernel materializes
    the flattened tensor; `donate=True` additionally aliases output onto the
    input HBM slab (caller must not reuse `x` afterwards).
    """
    n = x.shape[0]
    k = math.prod(x.shape[1:]) if x.ndim > 1 else 1
    x2d = x.reshape(n, k)  # metadata-only; same element order as torch .view

    if not force_copy:
        # Flatten is layout glue; skipping the kernel removes 2x-bytes of HBM
        # traffic plus launch overhead on every generation.
        return x2d

    total = n * k
    itemsize = jnp.dtype(x.dtype).itemsize
    sub = max(8, 32 // max(1, itemsize))  # 8 f32 / 16 bf16 / 32 int8 sublanes

    lane = _pick_lane(total, sub)
    if lane is None:
        # Ragged flat size: a masked-tail copy kernel would only add traffic.
        # TODO(synk): masked-tail Pallas copy if an explicit kernel is ever
        # required for non-128-multiple element counts.
        return x2d

    prof = _chip_profile()
    rows = total // lane
    row_bytes = lane * itemsize
    br = _pick_block_rows(rows, row_bytes, sub, prof["target_tile"],
                          prof["prefer_even_steps"])
    tile_bytes = br * row_bytes
    if tile_bytes > prof["full_tile_cap"]:
        # Degenerate full-extent tile would blow scoped VMEM; reshape instead.
        return x2d

    x_flat = x2d.reshape(rows, lane)
    grid_steps = rows // br

    in_spec = pl.BlockSpec((br, lane), lambda i: (i, 0))
    out_spec = pl.BlockSpec((br, lane), lambda i: (i, 0))

    # Working set = double-buffered input + double-buffered output.
    n_bufs = 4
    vmem_limit = int(min(prof["vmem_cap"],
                         max(4 << 20, n_bufs * tile_bytes + (1 << 20))))

    out = pl.pallas_call(
        _flatten_copy_kernel,
        out_shape=jax.ShapeDtypeStruct((rows, lane), x.dtype),
        grid_spec=pltpu.PrefetchScalarGridSpec(
            num_scalar_prefetch=0,
            grid=(grid_steps,),
            in_specs=[in_spec],
            out_specs=out_spec,
        ),
        compiler_params=pltpu.CompilerParams(
            dimension_semantics=("parallel",),
            vmem_limit_bytes=vmem_limit,
        ),
        # Identity copy with disjoint tiles: in-place is race-free, but only
        # alias when the caller actually donates the input (otherwise XLA
        # inserts a defensive full-tensor copy, raising traffic to 3x bytes).
        input_output_aliases=({0: 0} if donate else {}),
    )(x_flat)
    return out.reshape(n, k)


if __name__ == "__main__":
    key = jax.random.PRNGKey(0)

    # Small NCHW input matching the module's typical use: (2, 4, 16, 16).
    x = jax.random.normal(key, (2, 4, 16, 16), dtype=jnp.float32)
    y_ref = x.reshape(x.shape[0], -1)

    # Default path: metadata-only reshape (no kernel).
    y_fast = jax.block_until_ready(flatten_pallas(x))
    assert y_fast.shape == (2, 4 * 16 * 16), y_fast.shape
    assert jnp.array_equal(y_fast, y_ref), "Pallas flatten mismatch (bypass)"

    # Forced-copy path: exercises the Pallas identity-copy kernel.
    y = jax.block_until_ready(flatten_pallas(x, force_copy=True))
    assert y.shape == (2, 4 * 16 * 16), y.shape
    assert jnp.array_equal(y, y_ref), "Pallas flatten mismatch (kernel, small)"

    # Slightly larger input to exercise the tiled copy path.
    x2 = jax.random.normal(jax.random.PRNGKey(0), (8, 8, 32, 32), dtype=jnp.float32)
    y2 = jax.block_until_ready(flatten_pallas(x2, force_copy=True))
    y2_ref = x2.reshape(x2.shape[0], -1)
    assert y2.shape == (8, 8 * 32 * 32), y2.shape
    assert jnp.array_equal(y2, y2_ref), "Pallas flatten mismatch (kernel, tiled)"

    print("KERNEL_OK")
</pallas_src>

<mosaic_0001>
module attributes {stable_mosaic.version = 11 : i64} {
  func.func @_flatten_copy_kernel(%arg0: i32, %arg1: memref<16x128xf32, #tpu.memory_space<vmem>>, %arg2: memref<16x128xf32, #tpu.memory_space<vmem>>) attributes {dimension_semantics = [#tpu.dimension_semantics<parallel>], iteration_bounds = array<i64: 1>, scalar_prefetch = 0 : i64, scratch_operands = 0 : i64, tpu.core_type = #tpu.core_type<tc>, window_params = [{transform_indices = @transform_0, window_bounds = array<i64: 16, 128>}, {transform_indices = @transform_1, window_bounds = array<i64: 16, 128>}]} {
    %c0 = arith.constant 0 : index
    %c0_0 = arith.constant 0 : index
    %0 = vector.load %arg1[%c0, %c0_0] : memref<16x128xf32, #tpu.memory_space<vmem>>, vector<16x128xf32>
    %c0_1 = arith.constant 0 : index
    %c0_2 = arith.constant 0 : index
    %1 = vector.load %arg2[%c0_1, %c0_2] : memref<16x128xf32, #tpu.memory_space<vmem>>, vector<16x128xf32>
    tpu.vector_store %arg2[%c0_1, %c0_2], %0 {strides = array<i32>} : memref<16x128xf32, #tpu.memory_space<vmem>>, vector<16x128xf32>,
    return
  }
  func.func @transform_0(%arg0: i32) -> (i32, i32) {
    %c0_i32 = arith.constant 0 : i32
    %c0_i32_0 = arith.constant 0 : i32
    return %arg0, %c0_i32 : i32, i32
  }
  func.func @transform_1(%arg0: i32) -> (i32, i32) {
    %c0_i32 = arith.constant 0 : i32
    %c0_i32_0 = arith.constant 0 : i32
    return %arg0, %c0_i32 : i32, i32
  }
}

</mosaic_0001>

<bundles_post_ra>
// kernel: tpu_custom_call.1
= control target key start
LH: loop header
LB: loop body
LE: loop exit
PB: predicated region body
PF: predicated region fallthrough
CT: control target
= control target key end

     0   :  { %6 = vsyncpa [#allocation3], 0  ;;  %s112_s0 = inlined_call_operand.hbm [shape: f32[16,128], index: 0, kind: input, shape index: {}]   ;;  %s113_s1 = inlined_call_operand.hbm [shape: f32[16,128], index: 1, kind: output, shape index: {}]  }
   0x1   :  { %7 = vsyncpa [#allocation4], 0  ;;  %s92_s6 = smov [#allocation2]  }
   0x2   :  { %s13_s7 = sshll.u32 %s92_s6, 4  ;;  %s14_s7 = int_to_ptr.vmem [resolvable:$true] %s13_s7 }
   0x3   :  { %s56_s8 = scalar_lea.vmem %s14_s7, 256  ;;  %p61_p1 = scmp.lt.s32.totalorder %s14_s7, %s14_s7 }
   0x4   :  { %p57_p0 = scmp.ne.s32.totalorder %s14_s7, %s56_s8  ;;  %p62_p2 = scmp.lt.s32.totalorder %s56_s8, %s56_s8 }
   0x6   :  { %p63_p3 = por %p62_p2, %p61_p1 }
   0x8   :  { %p64_p4 = pnand %p63_p3, %p57_p0 }
   0xa   :  { %67 = shalt.err (!%p64_p4)
}
   0xb   :  { %s93_s9 = smov 128   ;;  %s94_s10 = smov 8  }
   0xc   :  { %19 = dma.hbm_to_vmem [thread:$0]  %s112_s0, 256, %s14_s7, [#allocation3], %s93_s9, %s93_s9, %s94_s10  }
   0xd   :  { %88 = dma.done.wait [#allocation3], 256  }
   0xe   :  { %89 = vsyncadd [#allocation3], 4294967040  ;;  %s95_s13 = smov [#allocation5]   ;;  %v23_v0 = vld [vmem:[#allocation2] sm:$0xff]  ;;  %v24_v1 = vld [vmem:[#allocation2 + $0x8] sm:$0xff] }
   0xf   :  { %s32_s14 = sshll.u32 %s95_s13, 4  ;;  %25 = vst [vmem:[#allocation5] sm:$0xff] %v23_v0  ;;  %26 = vst [vmem:[#allocation5 + $0x8] sm:$0xff] %v24_v1  ;;  %s33_s14 = int_to_ptr.vmem [resolvable:$true] %s32_s14 }
  0x10   :  { %s68_s15 = scalar_lea.vmem %s33_s14, 256  ;;  %p73_p6 = scmp.lt.s32.totalorder %s33_s14, %s33_s14 }
  0x11   :  { %p69_p5 = scmp.ne.s32.totalorder %s33_s14, %s68_s15  ;;  %p74_p7 = scmp.lt.s32.totalorder %s68_s15, %s68_s15 }
  0x13   :  { %p75_p8 = por %p74_p7, %p73_p6 }
  0x15   :  { %p76_p9 = pnand %p75_p8, %p69_p5 }
  0x17   :  { %79 = shalt.err (!%p76_p9)
}
  0x18   :  { %38 = dma.vmem_to_hbm [thread:$0]  %s33_s14, 256, %s113_s1, [#allocation4], %s93_s9, %s93_s9, %s94_s10  }
  0x19   :  { %90 = dma.done.wait [#allocation4], 256  }
  0x1a   :  { %91 = vsyncadd [#allocation4], 4294967040 }
  0x1b   :  { %42 = vsyncpa [#allocation3], 1 }
  0x1c   :  { %43 = vsyncpa [#allocation4], 1 }

</bundles_post_ra>
